<compile_context>
chip_gen: v7x
topology: tpu7x:2x2x1
jax: 0.10.0
libtpu: 0.0.40
codegen_flags: <defaults>
</compile_context>

<pallas_src>
import jax
import jax.numpy as jnp
from jax.experimental import pallas as pl
from jax.experimental.pallas import tpu as pltpu


def _round_up(x, m):
    return (x + m - 1) // m * m


def label_classifier_kernel(x_ref, w1_ref, b1_ref, w2_ref, b2_ref,
                            w3_ref, b3_ref, o_ref):
    # x tile: (TB, input_dim) bf16; weights bf16; biases f32; output f32.
    x = x_ref[...]

    h1 = jnp.dot(x, w1_ref[...], preferred_element_type=jnp.float32)
    h1 = jnp.maximum(h1 + b1_ref[...], 0.0).astype(jnp.bfloat16)

    h2 = jnp.dot(h1, w2_ref[...], preferred_element_type=jnp.float32)
    h2 = jnp.maximum(h2 + b2_ref[...], 0.0).astype(jnp.bfloat16)

    out = jnp.dot(h2, w3_ref[...], preferred_element_type=jnp.float32)
    o_ref[...] = (out + b3_ref[...]).astype(o_ref.dtype)


def label_classifier(x, w1, b1, w2, b2, w3, b3, *, batch_tile=256):
    """Pallas forward pass of the DANN LabelClassifier.

    x : (B, input_dim) float32
    w1: (input_dim, hidden_dim)   b1: (1, hidden_dim)
    w2: (hidden_dim, hidden_dim)  b2: (1, hidden_dim)
    w3: (hidden_dim, num_classes) b3: (1, num_classes)
    returns (B, num_classes) float32
    """
    B, input_dim = x.shape
    hidden_dim = w1.shape[1]
    num_classes = w3.shape[1]

    # --- lane-dense output padding (avoid masked vst on a narrow last dim) ---
    ncp = _round_up(num_classes, 128)
    if ncp != num_classes:
        w3 = jnp.pad(w3, ((0, 0), (0, ncp - num_classes)))
        b3 = jnp.pad(b3, ((0, 0), (0, ncp - num_classes)))

    # --- bf16 inputs/weights, f32 accumulation & biases ---
    xc = x.astype(jnp.bfloat16)
    w1c = w1.astype(jnp.bfloat16)
    w2c = w2.astype(jnp.bfloat16)
    w3c = w3.astype(jnp.bfloat16)
    b1c = b1.astype(jnp.float32)
    b2c = b2.astype(jnp.float32)
    b3c = b3.astype(jnp.float32)

    # --- batch tiling: tile multiple of 16 (bf16 sublane packing) ---
    tb = min(batch_tile, _round_up(B, 16))
    tb = _round_up(tb, 16)
    Bp = _round_up(B, tb)
    if Bp != B:
        xc = jnp.pad(xc, ((0, Bp - B), (0, 0)))

    grid = (Bp // tb,)

    resident = lambda i: (0, 0)  # weights/biases: same block every step -> one DMA
    in_specs = [
        pl.BlockSpec((tb, input_dim), lambda i: (i, 0)),          # x tile
        pl.BlockSpec((input_dim, hidden_dim), resident),          # w1
        pl.BlockSpec((1, hidden_dim), resident),                  # b1
        pl.BlockSpec((hidden_dim, hidden_dim), resident),         # w2
        pl.BlockSpec((1, hidden_dim), resident),                  # b2
        pl.BlockSpec((hidden_dim, ncp), resident),                # w3 (padded)
        pl.BlockSpec((1, ncp), resident),                         # b3 (padded)
    ]
    out_spec = pl.BlockSpec((tb, ncp), lambda i: (i, 0))

    flops = 2 * Bp * (input_dim * hidden_dim
                      + hidden_dim * hidden_dim
                      + hidden_dim * ncp)
    bytes_accessed = (
        xc.size * 2                                   # bf16 activations in
        + (w1c.size + w2c.size + w3c.size) * 2        # bf16 weights
        + (b1c.size + b2c.size + b3c.size) * 4        # f32 biases
        + Bp * ncp * 4                                # f32 output
    )

    out_padded = pl.pallas_call(
        label_classifier_kernel,
        out_shape=jax.ShapeDtypeStruct((Bp, ncp), jnp.float32),
        grid=grid,
        in_specs=in_specs,
        out_specs=out_spec,
        compiler_params=pltpu.CompilerParams(
            dimension_semantics=("parallel",),
            vmem_limit_bytes=64 << 20),
        cost_estimate=pl.CostEstimate(
            flops=flops, transcendentals=0, bytes_accessed=bytes_accessed),
    )(xc, w1c, b1c, w2c, b2c, w3c, b3c)

    return out_padded[:B, :num_classes]


def init_linear_params(key, in_features, out_features):
    """torch.nn.Linear-style init (uniform +-1/sqrt(fan_in)).

    Weight returned pre-transposed to (in_features, out_features); bias (1, out).
    """
    kw, kb = jax.random.split(key)
    bound = 1.0 / (in_features ** 0.5)
    w = jax.random.uniform(kw, (in_features, out_features), jnp.float32,
                           minval=-bound, maxval=bound)
    b = jax.random.uniform(kb, (1, out_features), jnp.float32,
                           minval=-bound, maxval=bound)
    return w, b


def reference_forward(x, w1, b1, w2, b2, w3, b3):
    # Same numerics as the kernel: bf16 operands, f32 accumulation.
    xb = x.astype(jnp.bfloat16)
    h1 = jnp.maximum(
        jnp.dot(xb, w1.astype(jnp.bfloat16),
                preferred_element_type=jnp.float32) + b1, 0.0).astype(jnp.bfloat16)
    h2 = jnp.maximum(
        jnp.dot(h1, w2.astype(jnp.bfloat16),
                preferred_element_type=jnp.float32) + b2, 0.0).astype(jnp.bfloat16)
    return jnp.dot(h2, w3.astype(jnp.bfloat16),
                   preferred_element_type=jnp.float32) + b3


if __name__ == "__main__":
    # Small shapes consistent with the module (input_dim / hidden_dim scaled down).
    batch = 16
    input_dim = 256
    hidden_dim = 128
    num_classes = 10

    key = jax.random.PRNGKey(0)
    kx, k1, k2, k3 = jax.random.split(key, 4)

    x = jax.random.normal(kx, (batch, input_dim), jnp.float32)
    w1, b1 = init_linear_params(k1, input_dim, hidden_dim)
    w2, b2 = init_linear_params(k2, hidden_dim, hidden_dim)
    w3, b3 = init_linear_params(k3, hidden_dim, num_classes)

    out = label_classifier(x, w1, b1, w2, b2, w3, b3)
    out = jax.block_until_ready(out)

    ref = reference_forward(x, w1, b1, w2, b2, w3, b3)
    assert out.shape == (batch, num_classes)
    assert jnp.allclose(out, ref, atol=2e-2, rtol=2e-2), \
        "mismatch vs pure-JAX (bf16) reference"

    # Sanity vs full-f32 math as well (loose tolerance for bf16 weights).
    ref_f32 = jnp.maximum(
        jnp.maximum(x @ w1 + b1, 0.0) @ w2 + b2, 0.0) @ w3 + b3
    assert jnp.allclose(out, ref_f32, atol=5e-2, rtol=5e-2), \
        "mismatch vs f32 reference beyond bf16 tolerance"

    print("KERNEL_OK")
</pallas_src>

<mosaic_0001>
module attributes {stable_mosaic.version = 11 : i64} {
  func.func @label_classifier_kernel(%arg0: i32, %arg1: memref<16x256xbf16, #tpu.memory_space<vmem>>, %arg2: memref<256x128xbf16, #tpu.memory_space<vmem>>, %arg3: memref<1x128xf32, #tpu.memory_space<vmem>>, %arg4: memref<128x128xbf16, #tpu.memory_space<vmem>>, %arg5: memref<1x128xf32, #tpu.memory_space<vmem>>, %arg6: memref<128x128xbf16, #tpu.memory_space<vmem>>, %arg7: memref<1x128xf32, #tpu.memory_space<vmem>>, %arg8: memref<16x128xf32, #tpu.memory_space<vmem>>) attributes {dimension_semantics = [#tpu.dimension_semantics<parallel>], iteration_bounds = array<i64: 1>, scalar_prefetch = 0 : i64, scratch_operands = 0 : i64, tpu.core_type = #tpu.core_type<tc>, window_params = [{transform_indices = @transform_0, window_bounds = array<i64: 16, 256>}, {pipeline_mode = #tpu.pipeline_mode<synchronous>, transform_indices = @transform_1, window_bounds = array<i64: 256, 128>}, {pipeline_mode = #tpu.pipeline_mode<synchronous>, transform_indices = @transform_2, window_bounds = array<i64: 1, 128>}, {pipeline_mode = #tpu.pipeline_mode<synchronous>, transform_indices = @transform_3, window_bounds = array<i64: 128, 128>}, {pipeline_mode = #tpu.pipeline_mode<synchronous>, transform_indices = @transform_4, window_bounds = array<i64: 1, 128>}, {pipeline_mode = #tpu.pipeline_mode<synchronous>, transform_indices = @transform_5, window_bounds = array<i64: 128, 128>}, {pipeline_mode = #tpu.pipeline_mode<synchronous>, transform_indices = @transform_6, window_bounds = array<i64: 1, 128>}, {transform_indices = @transform_7, window_bounds = array<i64: 16, 128>}]} {
    %c0 = arith.constant 0 : index
    %c0_0 = arith.constant 0 : index
    %0 = vector.load %arg1[%c0, %c0_0] : memref<16x256xbf16, #tpu.memory_space<vmem>>, vector<16x256xbf16>
    %c0_1 = arith.constant 0 : index
    %c0_2 = arith.constant 0 : index
    %1 = vector.load %arg2[%c0_1, %c0_2] : memref<256x128xbf16, #tpu.memory_space<vmem>>, vector<256x128xbf16>
    %cst = arith.constant dense<0.000000e+00> : vector<16x128xf32>
    %2 = tpu.matmul %0, %1, %cst {dimension_numbers = #tpu.dot_dimension_numbers<[1], [0], [0], [1], [0, 0, 1, 1], [], []>} : vector<16x256xbf16>, vector<256x128xbf16>, vector<16x128xf32> -> vector<16x128xf32>
    %c0_3 = arith.constant 0 : index
    %c0_4 = arith.constant 0 : index
    %3 = vector.load %arg3[%c0_3, %c0_4] : memref<1x128xf32, #tpu.memory_space<vmem>>, vector<1x128xf32>
    %4 = vector.broadcast %3 : vector<1x128xf32> to vector<16x128xf32>
    %5 = arith.addf %2, %4 : vector<16x128xf32>
    %cst_5 = arith.constant 0.000000e+00 : f32
    %6 = vector.broadcast %cst_5 : f32 to vector<16x128xf32>
    %7 = arith.maximumf %5, %6 : vector<16x128xf32>
    %8 = arith.truncf %7 : vector<16x128xf32> to vector<16x128xbf16>
    %c0_6 = arith.constant 0 : index
    %c0_7 = arith.constant 0 : index
    %9 = vector.load %arg4[%c0_6, %c0_7] : memref<128x128xbf16, #tpu.memory_space<vmem>>, vector<128x128xbf16>
    %cst_8 = arith.constant dense<0.000000e+00> : vector<16x128xf32>
    %10 = tpu.matmul %8, %9, %cst_8 {dimension_numbers = #tpu.dot_dimension_numbers<[1], [0], [0], [1], [0, 0, 1, 1], [], []>} : vector<16x128xbf16>, vector<128x128xbf16>, vector<16x128xf32> -> vector<16x128xf32>
    %c0_9 = arith.constant 0 : index
    %c0_10 = arith.constant 0 : index
    %11 = vector.load %arg5[%c0_9, %c0_10] : memref<1x128xf32, #tpu.memory_space<vmem>>, vector<1x128xf32>
    %12 = vector.broadcast %11 : vector<1x128xf32> to vector<16x128xf32>
    %13 = arith.addf %10, %12 : vector<16x128xf32>
    %cst_11 = arith.constant 0.000000e+00 : f32
    %14 = vector.broadcast %cst_11 : f32 to vector<16x128xf32>
    %15 = arith.maximumf %13, %14 : vector<16x128xf32>
    %16 = arith.truncf %15 : vector<16x128xf32> to vector<16x128xbf16>
    %c0_12 = arith.constant 0 : index
    %c0_13 = arith.constant 0 : index
    %17 = vector.load %arg6[%c0_12, %c0_13] : memref<128x128xbf16, #tpu.memory_space<vmem>>, vector<128x128xbf16>
    %cst_14 = arith.constant dense<0.000000e+00> : vector<16x128xf32>
    %18 = tpu.matmul %16, %17, %cst_14 {dimension_numbers = #tpu.dot_dimension_numbers<[1], [0], [0], [1], [0, 0, 1, 1], [], []>} : vector<16x128xbf16>, vector<128x128xbf16>, vector<16x128xf32> -> vector<16x128xf32>
    %c0_15 = arith.constant 0 : index
    %c0_16 = arith.constant 0 : index
    %19 = vector.load %arg7[%c0_15, %c0_16] : memref<1x128xf32, #tpu.memory_space<vmem>>, vector<1x128xf32>
    %20 = vector.broadcast %19 : vector<1x128xf32> to vector<16x128xf32>
    %21 = arith.addf %18, %20 : vector<16x128xf32>
    %c0_17 = arith.constant 0 : index
    %c0_18 = arith.constant 0 : index
    %22 = vector.load %arg8[%c0_17, %c0_18] : memref<16x128xf32, #tpu.memory_space<vmem>>, vector<16x128xf32>
    tpu.vector_store %arg8[%c0_17, %c0_18], %21 {strides = array<i32>} : memref<16x128xf32, #tpu.memory_space<vmem>>, vector<16x128xf32>,
    return
  }
  func.func @transform_0(%arg0: i32) -> (i32, i32) {
    %c0_i32 = arith.constant 0 : i32
    %c0_i32_0 = arith.constant 0 : i32
    return %arg0, %c0_i32 : i32, i32
  }
  func.func @transform_1(%arg0: i32) -> (i32, i32) {
    %c0_i32 = arith.constant 0 : i32
    %c0_i32_0 = arith.constant 0 : i32
    %c0_i32_1 = arith.constant 0 : i32
    return %c0_i32, %c0_i32_0 : i32, i32
  }
  func.func @transform_2(%arg0: i32) -> (i32, i32) {
    %c0_i32 = arith.constant 0 : i32
    %c0_i32_0 = arith.constant 0 : i32
    %c0_i32_1 = arith.constant 0 : i32
    return %c0_i32, %c0_i32_0 : i32, i32
  }
  func.func @transform_3(%arg0: i32) -> (i32, i32) {
    %c0_i32 = arith.constant 0 : i32
    %c0_i32_0 = arith.constant 0 : i32
    %c0_i32_1 = arith.constant 0 : i32
    return %c0_i32, %c0_i32_0 : i32, i32
  }
  func.func @transform_4(%arg0: i32) -> (i32, i32) {
    %c0_i32 = arith.constant 0 : i32
    %c0_i32_0 = arith.constant 0 : i32
    %c0_i32_1 = arith.constant 0 : i32
    return %c0_i32, %c0_i32_0 : i32, i32
  }
  func.func @transform_5(%arg0: i32) -> (i32, i32) {
    %c0_i32 = arith.constant 0 : i32
    %c0_i32_0 = arith.constant 0 : i32
    %c0_i32_1 = arith.constant 0 : i32
    return %c0_i32, %c0_i32_0 : i32, i32
  }
  func.func @transform_6(%arg0: i32) -> (i32, i32) {
    %c0_i32 = arith.constant 0 : i32
    %c0_i32_0 = arith.constant 0 : i32
    %c0_i32_1 = arith.constant 0 : i32
    return %c0_i32, %c0_i32_0 : i32, i32
  }
  func.func @transform_7(%arg0: i32) -> (i32, i32) {
    %c0_i32 = arith.constant 0 : i32
    %c0_i32_0 = arith.constant 0 : i32
    return %arg0, %c0_i32 : i32, i32
  }
}

</mosaic_0001>

<bundles_post_ra>
// kernel: tpu_custom_call.1
= control target key start
LH: loop header
LB: loop body
LE: loop exit
PB: predicated region body
PF: predicated region fallthrough
CT: control target
= control target key end

     0   :  { %12 = vsyncpa [#allocation3], 0  ;;  %s1092_s0 = inlined_call_operand.hbm [shape: bf16[16,256], index: 0, kind: input, shape index: {}]   ;;  %s1093_s1 = inlined_call_operand.hbm [shape: bf16[256,128], index: 1, kind: input, shape index: {}]   ;;  %s1094_s2 = inlined_call_operand.hbm [shape: f32[1,128], index: 2, kind: input, shape index: {}]   ;;  %s1095_s3 = inlined_call_operand.hbm [shape: bf16[128,128], index: 3, kind: input, shape index: {}]   ;;  %s1096_s4 = inlined_call_operand.hbm [shape: f32[1,128], index: 4, kind: input, shape index: {}]   ;;  %s1097_s5 = inlined_call_operand.hbm [shape: bf16[128,128], index: 5, kind: input, shape index: {}]   ;;  %s1098_s6 = inlined_call_operand.hbm [shape: f32[1,128], index: 6, kind: input, shape index: {}]   ;;  %s1099_s7 = inlined_call_operand.hbm [shape: f32[16,128], index: 7, kind: output, shape index: {}]  }
   0x1   :  { %13 = vsyncpa [#allocation6], 0 }
   0x2   :  { %14 = vsyncpa [#allocation9], 0 }
   0x3   :  { %15 = vsyncpa [#allocation12], 0 }
   0x4   :  { %16 = vsyncpa [#allocation4], 0  ;;  %s909_s24 = smov [#allocation5]   ;;  %s723_s28 = scalar_lea.hbm %s1093_s1, 2048 }
   0x5   :  { %s34_s25 = sshll.u32 %s909_s24, 4  ;;  %p724_p0 = scmp.ne.s32.totalorder %s1093_s1, %s723_s28  ;;  %s35_s25 = int_to_ptr.vmem [resolvable:$true] %s34_s25 }
   0x6   :  { %p727_p1 = scmp.lt.u32.totalorder %s723_s28, %s1093_s1 }
   0x8   :  { %p729_p2 = pnand %p727_p1, %p724_p0 }
   0xa   :  { %732 = shalt.err (!%p729_p2)
}
   0xb   :  { %s733_s10 = scalar_lea.vmem %s35_s25, 2048  ;;  %p738_p4 = scmp.lt.s32.totalorder %s35_s25, %s35_s25 }
   0xc   :  { %p734_p3 = scmp.ne.s32.totalorder %s35_s25, %s733_s10  ;;  %p739_p5 = scmp.lt.s32.totalorder %s733_s10, %s733_s10 }
   0xe   :  { %p740_p6 = por %p739_p5, %p738_p4 }
  0x10   :  { %p741_p7 = pnand %p740_p6, %p734_p3 }
  0x12   :  { %744 = shalt.err (!%p741_p7)
}
  0x13   :  { %s910_s11 = smov 64   ;;  %s911_s12 = smov 4  }
  0x14   :  { %40 = dma.hbm_to_vmem [thread:$0]  %s1093_s1, 2048, %s35_s25, [#allocation6], %s910_s11, %s910_s11, %s911_s12  }
  0x15   :  { %s912_s15 = smov [#allocation8]   ;;  %s913_s17 = smov [#allocation11]  }
  0x16   :  { %s56_s16 = sshll.u32 %s912_s15, 4  ;;  %s78_s18 = sshll.u32 %s913_s17, 4  ;;  %s57_s16 = int_to_ptr.vmem [resolvable:$true] %s56_s16  ;;  %s79_s18 = int_to_ptr.vmem [resolvable:$true] %s78_s18 }
  0x17   :  { %s745_s21 = scalar_lea.hbm %s1095_s3, 1024 }
  0x18   :  { %p746_p8 = scmp.ne.s32.totalorder %s1095_s3, %s745_s21  ;;  %p749_p9 = scmp.lt.u32.totalorder %s745_s21, %s1095_s3 }
  0x1a   :  { %p751_p10 = pnand %p749_p9, %p746_p8 }
  0x1c   :  { %754 = shalt.err (!%p751_p10)
}
  0x1d   :  { %s755_s1 = scalar_lea.vmem %s57_s16, 1024  ;;  %p760_p12 = scmp.lt.s32.totalorder %s57_s16, %s57_s16 }
  0x1e   :  { %p756_p11 = scmp.ne.s32.totalorder %s57_s16, %s755_s1  ;;  %p761_p13 = scmp.lt.s32.totalorder %s755_s1, %s755_s1 }
  0x20   :  { %p762_p0 = por %p761_p13, %p760_p12 }
  0x22   :  { %p763_p1 = pnand %p762_p0, %p756_p11 }
  0x24   :  { %766 = shalt.err (!%p763_p1)
}
  0x25   :  { %62 = dma.hbm_to_vmem [thread:$0]  %s1095_s3, 1024, %s57_s16, [#allocation9], %s910_s11, %s910_s11, %s911_s12  }
  0x26   :  { %s767_s30 = scalar_lea.hbm %s1097_s5, 1024 }
  0x27   :  { %p768_p2 = scmp.ne.s32.totalorder %s1097_s5, %s767_s30  ;;  %p771_p3 = scmp.lt.u32.totalorder %s767_s30, %s1097_s5 }
  0x29   :  { %p773_p4 = pnand %p771_p3, %p768_p2 }
  0x2b   :  { %776 = shalt.err (!%p773_p4)
}
  0x2c   :  { %s777_s14 = scalar_lea.vmem %s79_s18, 1024  ;;  %p782_p6 = scmp.lt.s32.totalorder %s79_s18, %s79_s18 }
  0x2d   :  { %p778_p5 = scmp.ne.s32.totalorder %s79_s18, %s777_s14  ;;  %p783_p7 = scmp.lt.s32.totalorder %s777_s14, %s777_s14 }
  0x2f   :  { %p784_p8 = por %p783_p7, %p782_p6 }
  0x31   :  { %p785_p9 = pnand %p784_p8, %p778_p5 }
  0x33   :  { %788 = shalt.err (!%p785_p9)
}
  0x34   :  { %84 = dma.hbm_to_vmem [thread:$0]  %s1097_s5, 1024, %s79_s18, [#allocation12], %s910_s11, %s910_s11, %s911_s12  }
  0x35   :  { %s914_s16 = smov [#allocation2]   ;;  %s789_s21 = scalar_lea.hbm %s1092_s0, 256 }
  0x36   :  { %s22_s17 = sshll.u32 %s914_s16, 4  ;;  %p790_p10 = scmp.ne.s32.totalorder %s1092_s0, %s789_s21  ;;  %s23_s17 = int_to_ptr.vmem [resolvable:$true] %s22_s17 }
  0x37   :  { %p793_p11 = scmp.lt.u32.totalorder %s789_s21, %s1092_s0 }
  0x39   :  { %p795_p12 = pnand %p793_p11, %p790_p10 }
  0x3b   :  { %798 = shalt.err (!%p795_p12)
}
  0x3c   :  { %s799_s1 = scalar_lea.vmem %s23_s17, 256  ;;  %p804_p0 = scmp.lt.s32.totalorder %s23_s17, %s23_s17 }
  0x3d   :  { %p800_p13 = scmp.ne.s32.totalorder %s23_s17, %s799_s1  ;;  %p805_p1 = scmp.lt.s32.totalorder %s799_s1, %s799_s1 }
  0x3f   :  { %p806_p2 = por %p805_p1, %p804_p0 }
  0x41   :  { %p807_p3 = pnand %p806_p2, %p800_p13 }
  0x43   :  { %810 = shalt.err (!%p807_p3)
}
  0x44   :  { %s915_s5 = smov 128   ;;  %s916_s11 = smov 8  }
  0x45   :  { %28 = dma.hbm_to_vmem [thread:$0]  %s1092_s0, 256, %s23_s17, [#allocation3], %s915_s5, %s915_s5, %s916_s11  }
  0x46   :  { %s917_s25 = smov [#allocation7]   ;;  %s918_s28 = smov [#allocation10]  }
  0x47   :  { %s47_s27 = sshll.u32 %s917_s25, 4  ;;  %s69_s29 = sshll.u32 %s918_s28, 4  ;;  %s48_s27 = int_to_ptr.vmem [resolvable:$true] %s47_s27  ;;  %s70_s29 = int_to_ptr.vmem [resolvable:$true] %s69_s29 }
  0x48   :  { %s811_s9 = scalar_lea.hbm %s1094_s2, 16 }
  0x49   :  { %p812_p4 = scmp.ne.s32.totalorder %s1094_s2, %s811_s9  ;;  %p815_p5 = scmp.lt.u32.totalorder %s811_s9, %s1094_s2 }
  0x4b   :  { %p817_p6 = pnand %p815_p5, %p812_p4 }
  0x4d   :  { %820 = shalt.err (!%p817_p6)
}
  0x4e   :  { %s821_s0 = scalar_lea.vmem %s48_s27, 16  ;;  %s825_s15 = scalar_lea.vmem %s48_s27, 32 }
  0x4f   :  { %p822_p7 = scmp.ne.s32.totalorder %s48_s27, %s821_s0  ;;  %p826_p8 = scmp.lt.s32.totalorder %s48_s27, %s48_s27 }
  0x50   :  { %p827_p9 = scmp.lt.s32.totalorder %s825_s15, %s821_s0 }
  0x52   :  { %p828_p10 = por %p827_p9, %p826_p8 }
  0x54   :  { %p829_p11 = pnand %p828_p10, %p822_p7 }
  0x56   :  { %832 = shalt.err (!%p829_p11)
}
  0x57   :  { %50 = dma.hbm_to_vmem [thread:$0]  %s1094_s2, 16, %s48_s27, [#allocation6]  }
  0x58   :  { %s833_s21 = scalar_lea.hbm %s1096_s4, 16 }
  0x59   :  { %p834_p12 = scmp.ne.s32.totalorder %s1096_s4, %s833_s21  ;;  %p837_p13 = scmp.lt.u32.totalorder %s833_s21, %s1096_s4 }
  0x5b   :  { %p839_p0 = pnand %p837_p13, %p834_p12 }
  0x5d   :  { %842 = shalt.err (!%p839_p0)
}
  0x5e   :  { %s843_s1 = scalar_lea.vmem %s70_s29, 16  ;;  %s847_s12 = scalar_lea.vmem %s70_s29, 32 }
  0x5f   :  { %p844_p1 = scmp.ne.s32.totalorder %s70_s29, %s843_s1  ;;  %p848_p2 = scmp.lt.s32.totalorder %s70_s29, %s70_s29 }
  0x60   :  { %p849_p3 = scmp.lt.s32.totalorder %s847_s12, %s843_s1 }
  0x62   :  { %p850_p4 = por %p849_p3, %p848_p2 }
  0x64   :  { %p851_p5 = pnand %p850_p4, %p844_p1 }
  0x66   :  { %854 = shalt.err (!%p851_p5)
}
  0x67   :  { %72 = dma.hbm_to_vmem [thread:$0]  %s1096_s4, 16, %s70_s29, [#allocation9]  }
  0x68   :  { %s919_s25 = smov [#allocation13]   ;;  %s855_s8 = scalar_lea.hbm %s1098_s6, 16 }
  0x69   :  { %s91_s27 = sshll.u32 %s919_s25, 4  ;;  %p856_p6 = scmp.ne.s32.totalorder %s1098_s6, %s855_s8  ;;  %s92_s27 = int_to_ptr.vmem [resolvable:$true] %s91_s27 }
  0x6a   :  { %p859_p7 = scmp.lt.u32.totalorder %s855_s8, %s1098_s6 }
  0x6c   :  { %p861_p8 = pnand %p859_p7, %p856_p6 }
  0x6e   :  { %864 = shalt.err (!%p861_p8)
}
  0x6f   :  { %s865_s3 = scalar_lea.vmem %s92_s27, 16  ;;  %s869_s4 = scalar_lea.vmem %s92_s27, 32 }
  0x70   :  { %p866_p9 = scmp.ne.s32.totalorder %s92_s27, %s865_s3  ;;  %p870_p10 = scmp.lt.s32.totalorder %s92_s27, %s92_s27 }
  0x71   :  { %p871_p11 = scmp.lt.s32.totalorder %s869_s4, %s865_s3 }
  0x73   :  { %p872_p12 = por %p871_p11, %p870_p10 }
  0x75   :  { %p873_p13 = pnand %p872_p12, %p866_p9 }
  0x77   :  { %876 = shalt.err (!%p873_p13)
}
  0x78   :  { %94 = dma.hbm_to_vmem [thread:$0]  %s1098_s6, 16, %s92_s27, [#allocation12]  }
  0x79   :  { %899 = dma.done.wait [#allocation3], 256  }
  0x7a   :  { %900 = vsyncadd [#allocation3], 4294967040 }
  0x7b   :  { %901 = dma.done.wait [#allocation6], 2064  }
  0x7c   :  { %902 = vsyncadd [#allocation6], 4294965232 }
  0x7d   :  { %903 = dma.done.wait [#allocation9], 1040  }
  0x7e   :  { %904 = vsyncadd [#allocation9], 4294966256 }
  0x7f   :  { %905 = dma.done.wait [#allocation12], 1040  }
  0x80   :  { %906 = vsyncadd [#allocation12], 4294966256  ;;  %v920_v0 = vmov 0.0   ;;  %v688_v1 = vld [vmem:[#allocation5 + $0x40] sm:$0xff]   ;;  %v690_v3 = vld [vmem:[#allocation5 + $0x48] sm:$0xff]   ;;  %vm921_vm0 = vmmov 0  }
  0x81   :  { %634 = vmatprep.subr.bf16.mxu1 %v920_v0  ;;  %v689_v2 = vld [vmem:[#allocation5] sm:$0xff]   ;;  %594 = vmatprep.subr.bf16.mxu0 %v688_v1  ;;  %v691_v4 = vld [vmem:[#allocation5 + $0x8] sm:$0xff]   ;;  %v692_v5 = vld [vmem:[#allocation5 + $0x50] sm:$0xff]   ;;  %s922_s6 = smov [#allocation14]  }
  0x82   :  { %595 = vmatpush3.bf16.msra.mxu0 %v689_v2  ;;  %v693_v6 = vld [vmem:[#allocation5 + $0x10] sm:$0xff]   ;;  %v694_v7 = vld [vmem:[#allocation5 + $0x58] sm:$0xff]   ;;  %v696_v9 = vld [vmem:[#allocation5 + $0x60] sm:$0xff]   ;;  %650 = vmatprep.mubr.msk.bf16.mxu1 %vm921_vm0, %v920_v0  ;;  %s542_s15 = sshll.u32 %s922_s6, 4  ;;  %s543_s15 = int_to_ptr.vmem [resolvable:$true] %s542_s15 }
  0x83   :  { %596 = vmatprep.subr.bf16.mxu0 %v690_v3  ;;  %v695_v8 = vld [vmem:[#allocation5 + $0x18] sm:$0xff]   ;;  %v697_v10 = vld [vmem:[#allocation5 + $0x20] sm:$0xff]   ;;  %v698_v11 = vld [vmem:[#allocation5 + $0x68] sm:$0xff]   ;;  %s877_s16 = scalar_lea.vmem %s543_s15, 256  ;;  %p882_p1 = scmp.lt.s32.totalorder %s543_s15, %s543_s15 }
  0x84   :  { %v699_v12 = vld [vmem:[#allocation5 + $0x28] sm:$0xff]   ;;  %v706_v13 = vld [vmem:[#allocation2 + $0x4] ss:$8 sps:$4 sm:$0xff]   ;;  %v704_v22 = vld [vmem:[#allocation2] ss:$8 sps:$4 sm:$0xff]   ;;  %p878_p0 = scmp.ne.s32.totalorder %s543_s15, %s877_s16  ;;  %p883_p2 = scmp.lt.s32.totalorder %s877_s16, %s877_s16 }
  0x85   :  { %v707_v14 = vld [vmem:[#allocation8] sm:$0xff]   ;;  %v700_v15 = vld [vmem:[#allocation5 + $0x70] sm:$0xff]   ;;  %296 = vmatprep.mubr.bf16.mxu0 %v706_v13  ;;  %v702_v18 = vld [vmem:[#allocation5 + $0x78] sm:$0xff]  }
  0x86   :  { %597 = vmatpush3.bf16.msra.mxu0 %v691_v4  ;;  %635 = vmatpush3.bf16.msra.mxu1 %v707_v14  ;;  %v708_v16 = vld [vmem:[#allocation8 + $0x8] sm:$0xff]   ;;  %v709_v19 = vld [vmem:[#allocation8 + $0x10] sm:$0xff]   ;;  %v710_v21 = vld [vmem:[#allocation8 + $0x18] sm:$0xff]   ;;  %p884_p3 = por %p883_p2, %p882_p1 }
  0x87   :  { %598 = vmatprep.subr.bf16.mxu0 %v692_v5  ;;  %v701_v17 = vld [vmem:[#allocation5 + $0x30] sm:$0xff]   ;;  %636 = vmatprep.subr.bf16.mxu1 %v920_v0  ;;  %v703_v20 = vld [vmem:[#allocation5 + $0x38] sm:$0xff]   ;;  %v711_v23 = vld [vmem:[#allocation8 + $0x20] sm:$0xff]  }
  0x88   :  { %v712_v24 = vld [vmem:[#allocation8 + $0x28] sm:$0xff]   ;;  %v713_v25 = vld [vmem:[#allocation8 + $0x30] sm:$0xff]   ;;  %v714_v26 = vld [vmem:[#allocation8 + $0x38] sm:$0xff]   ;;  %p885_p4 = pnand %p884_p3, %p878_p0 }
  0x89   :  { %v715_v27 = vld [vmem:[#allocation11] sm:$0xff]   ;;  %v716_v28 = vld [vmem:[#allocation11 + $0x8] sm:$0xff]   ;;  %v717_v29 = vld [vmem:[#allocation11 + $0x10] sm:$0xff]  }
  0x8a   :  { %599 = vmatpush3.bf16.msra.mxu0 %v693_v6  ;;  %637 = vmatpush3.bf16.msra.mxu1 %v708_v16  ;;  %v718_v30 = vld [vmem:[#allocation11 + $0x18] sm:$0xff]   ;;  %v719_v31 = vld [vmem:[#allocation11 + $0x20] sm:$0xff]   ;;  %v720_v32 = vld [vmem:[#allocation11 + $0x28] sm:$0xff]  }
  0x8b   :  { %600 = vmatprep.subr.bf16.mxu0 %v694_v7  ;;  %638 = vmatprep.subr.bf16.mxu1 %v920_v0  ;;  %v557_v34 = vld [vmem:[#allocation7] ss:$0 sm:$0xff]  ;;  %v721_v45 = vld [vmem:[#allocation11 + $0x30] sm:$0xff]   ;;  %v576_v47 = vld [vmem:[#allocation10] ss:$0 sm:$0xff] }
  0x8c   :  { %v722_v46 = vld [vmem:[#allocation11 + $0x38] sm:$0xff]   ;;  %v585_v57 = vld [vmem:[#allocation13] ss:$0 sm:$0xff] }
  0x8e   :  { %601 = vmatpush3.bf16.msra.mxu0 %v695_v8  ;;  %639 = vmatpush3.bf16.msra.mxu1 %v709_v19 }
  0x8f   :  { %602 = vmatprep.subr.bf16.mxu0 %v696_v9  ;;  %640 = vmatprep.subr.bf16.mxu1 %v920_v0 }
  0x92   :  { %603 = vmatpush3.bf16.msra.mxu0 %v697_v10  ;;  %641 = vmatpush3.bf16.msra.mxu1 %v710_v21 }
  0x93   :  { %604 = vmatprep.subr.bf16.mxu0 %v698_v11  ;;  %642 = vmatprep.subr.bf16.mxu1 %v920_v0 }
  0x96   :  { %605 = vmatpush3.bf16.msra.mxu0 %v699_v12  ;;  %643 = vmatpush3.bf16.msra.mxu1 %v711_v23 }
  0x97   :  { %606 = vmatprep.subr.bf16.mxu0 %v700_v15  ;;  %644 = vmatprep.subr.bf16.mxu1 %v920_v0 }
  0x9a   :  { %607 = vmatpush3.bf16.msra.mxu0 %v701_v17  ;;  %645 = vmatpush3.bf16.msra.mxu1 %v712_v24 }
  0x9b   :  { %608 = vmatprep.subr.bf16.mxu0 %v702_v18  ;;  %646 = vmatprep.subr.bf16.mxu1 %v920_v0 }
  0x9e   :  { %609 = vmatpush3.bf16.msra.mxu0 %v703_v20  ;;  %647 = vmatpush3.bf16.msra.mxu1 %v713_v25 }
  0x9f   :  { %654 = vmatprep.subr.bf16.mxu0 %v920_v0  ;;  %648 = vmatprep.subr.bf16.mxu1 %v920_v0 }
  0xa1   :  { %297 = vmatmul.mubr.bf16.vlgmr.msra.gmra.mrb[0].mxu0 %v704_v22 }
  0xa2   :  { %649 = vmatpush3.bf16.msra.mxu1 %v714_v26  ;;  %670 = vmatprep.mubr.msk.bf16.mxu0 %vm921_vm0, %v920_v0 }
  0xa3   :  { %655 = vmatpush3.bf16.msra.mxu0 %v715_v27 }
  0xa4   :  { %656 = vmatprep.subr.bf16.mxu0 %v920_v0 }
  0xa7   :  { %657 = vmatpush3.bf16.msra.mxu0 %v716_v28 }
  0xa8   :  { %658 = vmatprep.subr.bf16.mxu0 %v920_v0 }
  0xab   :  { %659 = vmatpush3.bf16.msra.mxu0 %v717_v29 }
  0xac   :  { %660 = vmatprep.subr.bf16.mxu0 %v920_v0 }
  0xaf   :  { %661 = vmatpush3.bf16.msra.mxu0 %v718_v30 }
  0xb0   :  { %662 = vmatprep.subr.bf16.mxu0 %v920_v0 }
  0xb3   :  { %663 = vmatpush3.bf16.msra.mxu0 %v719_v31 }
  0xb4   :  { %664 = vmatprep.subr.bf16.mxu0 %v920_v0 }
  0xb7   :  { %665 = vmatpush3.bf16.msra.mxu0 %v720_v32 }
  0xb8   :  { %666 = vmatprep.subr.bf16.mxu0 %v920_v0 }
  0xbb   :  { %667 = vmatpush3.bf16.msra.mxu0 %v721_v45 }
  0xbc   :  { %668 = vmatprep.subr.bf16.mxu0 %v920_v0 }
  0xbf   :  { %669 = vmatpush3.bf16.msra.mxu0 %v722_v46 }
 0x174   :  { %v610_v33 = vpop.f32.mrb[0].mxu0 }
 0x175   :  { %v611_v35 = vpop.f32.mrb[1].mxu0 }
 0x176   :  { %v612_v36 = vadd.f32 %v611_v35, %v610_v33  ;;  %v613_v37 = vpop.f32.mrb[2].mxu0 }
 0x177   :  { %v614_v38 = vpop.f32.mrb[3].mxu0 }
 0x178   :  { %v299_v39 = vadd.f32 %v612_v36, %v557_v34  ;;  %v615_v40 = vadd.f32 %v614_v38, %v613_v37 }
 0x17a   :  { %v302_v41 = vadd.f32 %v615_v40, %v557_v34  ;;  %v305_v42 = vmax.f32 %v299_v39, 0.0 }
 0x17c   :  { %v306_v43 = vmax.f32 %v302_v41, 0.0 }
 0x17e   :  { %v307_v44 = vpack.c.bf16 %v306_v43, %v305_v42 }
 0x180   :  { %651 = vmatmul.mubr.bf16.vlgmr.msra.gmra.mrb[0].mxu1 %v307_v44 }
 0x253   :  { %v413_v48 = vpop.f32.mrb[0].mxu1 }
 0x254   :  { %v414_v49 = vadd.f32 %v576_v47, %v413_v48  ;;  %v652_v50 = vpop.f32.mrb[1].mxu1 }
 0x255   :  { %v416_v51 = vpop.f32.mrb[2].mxu1 }
 0x256   :  { %v417_v52 = vadd.f32 %v576_v47, %v416_v51  ;;  %v653_v53 = vpop.f32.mrb[3].mxu1  ;;  %v420_v54 = vmax.f32 %v414_v49, 0.0 }
 0x258   :  { %v421_v55 = vmax.f32 %v417_v52, 0.0 }
 0x25a   :  { %v422_v56 = vpack.c.bf16 %v421_v55, %v420_v54 }
 0x25c   :  { %671 = vmatmul.mubr.bf16.vlgmr.msra.gmra.mrb[4].mxu0 %v422_v56 }
 0x32f   :  { %v528_v58 = vpop.f32.mrb[4].mxu0 }
 0x330   :  { %v529_v59 = vadd.f32 %v585_v57, %v528_v58  ;;  %v672_v60 = vpop.f32.mrb[5].mxu0 }
 0x331   :  { %v531_v61 = vpop.f32.mrb[6].mxu0 }
 0x332   :  { %535 = vst [vmem:[#allocation14] sm:$0xff] %v529_v59  ;;  %v532_v62 = vadd.f32 %v585_v57, %v531_v61  ;;  %v673_v63 = vpop.f32.mrb[7].mxu0 }
 0x334   :  { %536 = vst [vmem:[#allocation14 + $0x8] sm:$0xff] %v532_v62 }
 0x335   :  { %888 = shalt.err (!%p885_p4)
}
 0x336   :  { %s889_s20 = scalar_lea.hbm %s1099_s7, 256 }
 0x337   :  { %p890_p5 = scmp.ne.s32.totalorder %s1099_s7, %s889_s20  ;;  %p893_p6 = scmp.lt.u32.totalorder %s889_s20, %s1099_s7 }
 0x339   :  { %p895_p7 = pnand %p893_p6, %p890_p5 }
 0x33b   :  { %898 = shalt.err (!%p895_p7)
}
 0x33c   :  { %548 = dma.vmem_to_hbm [thread:$0]  %s543_s15, 256, %s1099_s7, [#allocation4], %s915_s5, %s915_s5, %s916_s11  }
 0x33d   :  { %907 = dma.done.wait [#allocation4], 256  }
 0x33e   :  { %908 = vsyncadd [#allocation4], 4294967040 }
 0x33f   :  { %552 = vsyncpa [#allocation3], 1 }
 0x340   :  { %553 = vsyncpa [#allocation6], 1 }
 0x341   :  { %554 = vsyncpa [#allocation9], 1 }
 0x342   :  { %555 = vsyncpa [#allocation12], 1 }
 0x343   :  { %556 = vsyncpa [#allocation4], 1 }

</bundles_post_ra>
